<compile_context>
chip_gen: v7x
topology: tpu7x:2x2x1
jax: 0.10.0
libtpu: 0.0.40
codegen_flags: <defaults>
</compile_context>

<pallas_src>
import functools

import jax
import jax.numpy as jnp
import numpy as np
from jax.experimental import pallas as pl
from jax.experimental.pallas import tpu as pltpu

EPS = 1e-5                 # BatchNorm1d eps
PAD = 128                  # lane-dense padding for every feature dim
MXU_DTYPE = jnp.bfloat16   # MXU operand dtype (f32 accumulation)


# ----------------------------------------------------------------------------
# Fused kernel
# ----------------------------------------------------------------------------
def fused_gearnet_kernel(x_ref, wemb_ref, bemb_ref, gamma_ref, beta_ref,
                         adj_ref, wrel_ref, wself_ref, bias_ref, onehot_ref,
                         nf_ref, gf_ref, *, num_layers, num_relation,
                         shortcuts):
    # ---- embedding: Linear + BatchNorm1d (training-mode batch stats) -------
    y = jnp.dot(x_ref[...].astype(MXU_DTYPE), wemb_ref[...],
                preferred_element_type=jnp.float32) + bemb_ref[...]
    mean = jnp.mean(y, axis=0, keepdims=True)
    var = jnp.mean((y - mean) ** 2, axis=0, keepdims=True)
    h = (y - mean) * jax.lax.rsqrt(var + EPS) * gamma_ref[...] + beta_ref[...]

    # ---- GeometricRelationalGraphConv stack (statically unrolled) ----------
    for l in range(num_layers):
        h_mm = h.astype(MXU_DTYPE)
        # self-loop linear initialises the accumulator; combined bias added once
        out = jnp.dot(h_mm, wself_ref[l],
                      preferred_element_type=jnp.float32) + bias_ref[l]
        for r in range(num_relation):
            msg = jnp.dot(adj_ref[r], h_mm,
                          preferred_element_type=jnp.float32)
            out = out + jnp.dot(msg.astype(MXU_DTYPE), wrel_ref[l, r],
                                preferred_element_type=jnp.float32)
        out = jnp.maximum(out, 0.0)          # relu; dropout(p=0) == identity
        if shortcuts[l]:                     # short_cut=True and dims match
            out = out + h
        h = out

    # concat_hidden=False -> node_feature is the last hidden
    nf_ref[...] = h
    # SumReadout as one-hot (G, N) @ (N, D) matmul (kept f32 for accuracy)
    gf_ref[...] = jnp.dot(onehot_ref[...], h,
                          preferred_element_type=jnp.float32)


# ----------------------------------------------------------------------------
# Parameter preparation (padding to lane-dense 128, bf16 cast, bias fusion)
# ----------------------------------------------------------------------------
def _pad_2d(a, rows, cols):
    a = jnp.asarray(a, jnp.float32)
    return jnp.zeros((rows, cols), jnp.float32).at[:a.shape[0],
                                                   :a.shape[1]].set(a)


def prepare_params(params, dims, num_relation, pad=PAD):
    assert max(dims) <= pad, "feature dims must fit in the lane pad width"
    prep = {
        "w_emb": _pad_2d(params["w_emb"], params["w_emb"].shape[0],
                         pad).astype(MXU_DTYPE),
        "b_emb": _pad_2d(params["b_emb"][None, :], 1, pad),
        "gamma": _pad_2d(params["gamma"][None, :], 1, pad),
        "beta": _pad_2d(params["beta"][None, :], 1, pad),
    }
    w_rel_all, w_self_all, bias_all = [], [], []
    for i, (w_rel_flat, b_rel, w_self, b_self) in enumerate(params["layers"]):
        din, dout = dims[i], dims[i + 1]
        w_rel = w_rel_flat.reshape(num_relation, din, dout)
        w_rel_p = jnp.zeros((num_relation, pad, pad), jnp.float32)
        w_rel_p = w_rel_p.at[:, :din, :dout].set(w_rel)
        w_rel_all.append(w_rel_p.astype(MXU_DTYPE))
        w_self_all.append(_pad_2d(w_self, pad, pad).astype(MXU_DTYPE))
        # b_rel + b_self pre-combined: one fewer operand + one fewer VPU add.
        bias_all.append(_pad_2d((b_rel + b_self)[None, :], 1, pad))
    prep["w_rel"] = jnp.stack(w_rel_all)     # (L, R, PAD, PAD)  bf16
    prep["w_self"] = jnp.stack(w_self_all)   # (L, PAD, PAD)     bf16
    prep["bias"] = jnp.stack(bias_all)       # (L, 1, PAD)       f32
    return prep


# ----------------------------------------------------------------------------
# Wrapper
# ----------------------------------------------------------------------------
def gearnet_forward(x, adj, node2graph, num_graphs, params, dims):
    N = x.shape[0]
    R = adj.shape[0]
    L = len(params["layers"])
    # short_cut=True -> residual whenever (unpadded) in/out dims match
    shortcuts = tuple(dims[i] == dims[i + 1] for i in range(L))
    prep = prepare_params(params, dims, R)

    onehot = (node2graph[None, :] ==
              jnp.arange(num_graphs)[:, None]).astype(jnp.float32)
    adj_mm = adj.astype(MXU_DTYPE)   # edge counts are exact in bf16

    inputs = (x, prep["w_emb"], prep["b_emb"], prep["gamma"], prep["beta"],
              adj_mm, prep["w_rel"], prep["w_self"], prep["bias"], onehot)
    in_specs = [pl.BlockSpec(a.shape, lambda i, nd=a.ndim: (0,) * nd)
                for a in inputs]

    kern = functools.partial(fused_gearnet_kernel, num_layers=L,
                             num_relation=R, shortcuts=shortcuts)
    nf_pad, gf_pad = pl.pallas_call(
        kern,
        out_shape=(jax.ShapeDtypeStruct((N, PAD), jnp.float32),
                   jax.ShapeDtypeStruct((num_graphs, PAD), jnp.float32)),
        grid=(1,),
        in_specs=in_specs,
        out_specs=(pl.BlockSpec((N, PAD), lambda i: (0, 0)),
                   pl.BlockSpec((num_graphs, PAD), lambda i: (0, 0))),
        compiler_params=pltpu.CompilerParams(
            dimension_semantics=("arbitrary",)),
    )(*inputs)

    dout = dims[-1]
    return {"graph_feature": gf_pad[:, :dout],
            "node_feature": nf_pad[:, :dout]}


# ----------------------------------------------------------------------------
# Pure-JAX reference (scatter-add form, identical semantics, full f32)
# ----------------------------------------------------------------------------
def ref_forward(x, edge_list, edge_weight, node2graph, num_graphs,
                params, dims, R, N):
    y = x @ params["w_emb"] + params["b_emb"]
    mean = jnp.mean(y, axis=0, keepdims=True)
    var = jnp.mean((y - mean) ** 2, axis=0, keepdims=True)
    layer_input = ((y - mean) / jnp.sqrt(var + EPS)) * params["gamma"] + \
        params["beta"]

    node_in, node_out, rel = edge_list[:, 0], edge_list[:, 1], edge_list[:, 2]
    for i, (w_rel_flat, b_rel, w_self, b_self) in enumerate(params["layers"]):
        din, dout = dims[i], dims[i + 1]
        msg = layer_input[node_in] * edge_weight[:, None]
        idx = node_out * R + rel
        update = jnp.zeros((N * R, din), jnp.float32).at[idx].add(msg)
        update = update.reshape(N, R * din)
        out = update @ w_rel_flat + b_rel + layer_input @ w_self + b_self
        out = jax.nn.relu(out)
        if din == dout:
            out = out + layer_input
        layer_input = out
    node_feature = layer_input
    graph_feature = jax.ops.segment_sum(node_feature, node2graph,
                                        num_segments=num_graphs)
    return {"graph_feature": graph_feature, "node_feature": node_feature}


# ----------------------------------------------------------------------------
if __name__ == "__main__":
    key = jax.random.PRNGKey(0)
    N, Din, Demb, R, Eedges, G = 32, 16, 32, 3, 96, 2
    hidden_dims = [32, 32]
    dims = [Demb] + hidden_dims

    ks = jax.random.split(key, 12)
    x = jax.random.normal(ks[0], (N, Din), jnp.float32)
    node_in = jax.random.randint(ks[1], (Eedges,), 0, N)
    node_out = jax.random.randint(ks[2], (Eedges,), 0, N)
    rel = jax.random.randint(ks[3], (Eedges,), 0, R)
    edge_list = jnp.stack([node_in, node_out, rel], axis=1)
    edge_weight = jnp.ones((Eedges,), jnp.float32)
    node2graph = (jnp.arange(N) >= N // 2).astype(jnp.int32)

    # deterministic synthetic parameters
    params = {
        "w_emb": 0.1 * jax.random.normal(ks[4], (Din, Demb), jnp.float32),
        "b_emb": 0.1 * jax.random.normal(ks[5], (Demb,), jnp.float32),
        "gamma": 1.0 + 0.1 * jax.random.normal(ks[6], (Demb,), jnp.float32),
        "beta": 0.1 * jax.random.normal(ks[7], (Demb,), jnp.float32),
        "layers": [],
    }
    for i in range(len(hidden_dims)):
        kk = jax.random.split(ks[8 + i], 4)
        din, dout = dims[i], dims[i + 1]
        params["layers"].append((
            0.1 * jax.random.normal(kk[0], (R * din, dout), jnp.float32),
            0.1 * jax.random.normal(kk[1], (dout,), jnp.float32),
            0.1 * jax.random.normal(kk[2], (din, dout), jnp.float32),
            0.1 * jax.random.normal(kk[3], (dout,), jnp.float32),
        ))

    # densify the relational graph (glue / preprocessing)
    adj = jnp.zeros((R, N, N), jnp.float32).at[rel, node_out, node_in].add(
        edge_weight)

    out = gearnet_forward(x, adj, node2graph, G, params, dims)
    out = jax.tree_util.tree_map(jax.block_until_ready, out)

    ref = ref_forward(x, edge_list, edge_weight, node2graph, G,
                      params, dims, R, N)

    # bf16 MXU operands (f32 accumulation) -> slightly looser tolerance than
    # the pure-f32 reference; structure errors would be orders larger.
    tol = 3e-2 if MXU_DTYPE == jnp.bfloat16 else 2e-3
    np.testing.assert_allclose(np.asarray(out["node_feature"]),
                               np.asarray(ref["node_feature"]),
                               rtol=tol, atol=tol)
    np.testing.assert_allclose(np.asarray(out["graph_feature"]),
                               np.asarray(ref["graph_feature"]),
                               rtol=tol, atol=tol)
    print("KERNEL_OK")
</pallas_src>

<mosaic_0001>
module attributes {stable_mosaic.version = 11 : i64} {
  func.func @fused_gearnet_kernel(%arg0: i32, %arg1: memref<32x16xf32, #tpu.memory_space<vmem>>, %arg2: memref<16x128xbf16, #tpu.memory_space<vmem>>, %arg3: memref<1x128xf32, #tpu.memory_space<vmem>>, %arg4: memref<1x128xf32, #tpu.memory_space<vmem>>, %arg5: memref<1x128xf32, #tpu.memory_space<vmem>>, %arg6: memref<3x32x32xbf16, #tpu.memory_space<vmem>>, %arg7: memref<2x3x128x128xbf16, #tpu.memory_space<vmem>>, %arg8: memref<2x128x128xbf16, #tpu.memory_space<vmem>>, %arg9: memref<2x1x128xf32, #tpu.memory_space<vmem>>, %arg10: memref<2x32xf32, #tpu.memory_space<vmem>>, %arg11: memref<32x128xf32, #tpu.memory_space<vmem>>, %arg12: memref<2x128xf32, #tpu.memory_space<vmem>>) attributes {dimension_semantics = [#tpu.dimension_semantics<arbitrary>], iteration_bounds = array<i64: 1>, scalar_prefetch = 0 : i64, scratch_operands = 0 : i64, tpu.core_type = #tpu.core_type<tc>, window_params = [{pipeline_mode = #tpu.pipeline_mode<synchronous>, transform_indices = @transform_0, window_bounds = array<i64: 32, 16>}, {pipeline_mode = #tpu.pipeline_mode<synchronous>, transform_indices = @transform_1, window_bounds = array<i64: 16, 128>}, {pipeline_mode = #tpu.pipeline_mode<synchronous>, transform_indices = @transform_2, window_bounds = array<i64: 1, 128>}, {pipeline_mode = #tpu.pipeline_mode<synchronous>, transform_indices = @transform_3, window_bounds = array<i64: 1, 128>}, {pipeline_mode = #tpu.pipeline_mode<synchronous>, transform_indices = @transform_4, window_bounds = array<i64: 1, 128>}, {pipeline_mode = #tpu.pipeline_mode<synchronous>, transform_indices = @transform_5, window_bounds = array<i64: 3, 32, 32>}, {pipeline_mode = #tpu.pipeline_mode<synchronous>, transform_indices = @transform_6, window_bounds = array<i64: 2, 3, 128, 128>}, {pipeline_mode = #tpu.pipeline_mode<synchronous>, transform_indices = @transform_7, window_bounds = array<i64: 2, 128, 128>}, {pipeline_mode = #tpu.pipeline_mode<synchronous>, transform_indices = @transform_8, window_bounds = array<i64: 2, 1, 128>}, {pipeline_mode = #tpu.pipeline_mode<synchronous>, transform_indices = @transform_9, window_bounds = array<i64: 2, 32>}, {pipeline_mode = #tpu.pipeline_mode<synchronous>, transform_indices = @transform_10, window_bounds = array<i64: 32, 128>}, {pipeline_mode = #tpu.pipeline_mode<synchronous>, transform_indices = @transform_11, window_bounds = array<i64: 2, 128>}]} {
    %c0 = arith.constant 0 : index
    %c0_0 = arith.constant 0 : index
    %0 = vector.load %arg1[%c0, %c0_0] : memref<32x16xf32, #tpu.memory_space<vmem>>, vector<32x16xf32>
    %1 = arith.truncf %0 : vector<32x16xf32> to vector<32x16xbf16>
    %c0_1 = arith.constant 0 : index
    %c0_2 = arith.constant 0 : index
    %2 = vector.load %arg2[%c0_1, %c0_2] : memref<16x128xbf16, #tpu.memory_space<vmem>>, vector<16x128xbf16>
    %cst = arith.constant dense<0.000000e+00> : vector<32x128xf32>
    %3 = tpu.matmul %1, %2, %cst {dimension_numbers = #tpu.dot_dimension_numbers<[1], [0], [0], [1], [0, 0, 1, 1], [], []>} : vector<32x16xbf16>, vector<16x128xbf16>, vector<32x128xf32> -> vector<32x128xf32>
    %c0_3 = arith.constant 0 : index
    %c0_4 = arith.constant 0 : index
    %4 = vector.load %arg3[%c0_3, %c0_4] : memref<1x128xf32, #tpu.memory_space<vmem>>, vector<1x128xf32>
    %5 = vector.broadcast %4 : vector<1x128xf32> to vector<32x128xf32>
    %6 = arith.addf %3, %5 : vector<32x128xf32>
    %cst_5 = arith.constant dense<0.000000e+00> : vector<128xf32>
    %7 = vector.multi_reduction <add>, %6, %cst_5 [0] : vector<32x128xf32> to vector<128xf32>
    %8 = vector.shape_cast %7 : vector<128xf32> to vector<1x128xf32>
    %cst_6 = arith.constant 3.200000e+01 : f32
    %9 = vector.broadcast %cst_6 : f32 to vector<1x128xf32>
    %10 = arith.divf %8, %9 : vector<1x128xf32>
    %11 = vector.broadcast %10 : vector<1x128xf32> to vector<32x128xf32>
    %12 = arith.subf %6, %11 : vector<32x128xf32>
    %13 = arith.mulf %12, %12 : vector<32x128xf32>
    %cst_7 = arith.constant dense<0.000000e+00> : vector<128xf32>
    %14 = vector.multi_reduction <add>, %13, %cst_7 [0] : vector<32x128xf32> to vector<128xf32>
    %15 = vector.shape_cast %14 : vector<128xf32> to vector<1x128xf32>
    %cst_8 = arith.constant 3.200000e+01 : f32
    %16 = vector.broadcast %cst_8 : f32 to vector<1x128xf32>
    %17 = arith.divf %15, %16 : vector<1x128xf32>
    %18 = vector.broadcast %10 : vector<1x128xf32> to vector<32x128xf32>
    %19 = arith.subf %6, %18 : vector<32x128xf32>
    %cst_9 = arith.constant 9.99999974E-6 : f32
    %20 = vector.broadcast %cst_9 : f32 to vector<1x128xf32>
    %21 = arith.addf %17, %20 : vector<1x128xf32>
    %22 = math.rsqrt %21 : vector<1x128xf32>
    %23 = vector.broadcast %22 : vector<1x128xf32> to vector<32x128xf32>
    %24 = arith.mulf %19, %23 : vector<32x128xf32>
    %c0_10 = arith.constant 0 : index
    %c0_11 = arith.constant 0 : index
    %25 = vector.load %arg4[%c0_10, %c0_11] : memref<1x128xf32, #tpu.memory_space<vmem>>, vector<1x128xf32>
    %26 = vector.broadcast %25 : vector<1x128xf32> to vector<32x128xf32>
    %27 = arith.mulf %24, %26 : vector<32x128xf32>
    %c0_12 = arith.constant 0 : index
    %c0_13 = arith.constant 0 : index
    %28 = vector.load %arg5[%c0_12, %c0_13] : memref<1x128xf32, #tpu.memory_space<vmem>>, vector<1x128xf32>
    %29 = vector.broadcast %28 : vector<1x128xf32> to vector<32x128xf32>
    %30 = arith.addf %27, %29 : vector<32x128xf32>
    %31 = arith.truncf %30 : vector<32x128xf32> to vector<32x128xbf16>
    %c0_14 = arith.constant 0 : index
    %c0_15 = arith.constant 0 : index
    %c0_16 = arith.constant 0 : index
    %32 = vector.load %arg8[%c0_14, %c0_15, %c0_16] : memref<2x128x128xbf16, #tpu.memory_space<vmem>>, vector<1x128x128xbf16>
    %33 = vector.shape_cast %32 : vector<1x128x128xbf16> to vector<128x128xbf16>
    %cst_17 = arith.constant dense<0.000000e+00> : vector<32x128xf32>
    %34 = tpu.matmul %31, %33, %cst_17 {dimension_numbers = #tpu.dot_dimension_numbers<[1], [0], [0], [1], [0, 0, 1, 1], [], []>} : vector<32x128xbf16>, vector<128x128xbf16>, vector<32x128xf32> -> vector<32x128xf32>
    %c0_18 = arith.constant 0 : index
    %c0_19 = arith.constant 0 : index
    %c0_20 = arith.constant 0 : index
    %35 = vector.load %arg9[%c0_18, %c0_19, %c0_20] : memref<2x1x128xf32, #tpu.memory_space<vmem>>, vector<1x1x128xf32>
    %36 = vector.shape_cast %35 : vector<1x1x128xf32> to vector<1x128xf32>
    %37 = vector.broadcast %36 : vector<1x128xf32> to vector<32x128xf32>
    %38 = arith.addf %34, %37 : vector<32x128xf32>
    %c0_21 = arith.constant 0 : index
    %c0_22 = arith.constant 0 : index
    %c0_23 = arith.constant 0 : index
    %39 = vector.load %arg6[%c0_21, %c0_22, %c0_23] : memref<3x32x32xbf16, #tpu.memory_space<vmem>>, vector<1x32x32xbf16>
    %40 = vector.shape_cast %39 : vector<1x32x32xbf16> to vector<32x32xbf16>
    %cst_24 = arith.constant dense<0.000000e+00> : vector<32x128xf32>
    %41 = tpu.matmul %40, %31, %cst_24 {dimension_numbers = #tpu.dot_dimension_numbers<[1], [0], [0], [1], [0, 0, 1, 1], [], []>} : vector<32x32xbf16>, vector<32x128xbf16>, vector<32x128xf32> -> vector<32x128xf32>
    %42 = arith.truncf %41 : vector<32x128xf32> to vector<32x128xbf16>
    %c0_25 = arith.constant 0 : index
    %c0_26 = arith.constant 0 : index
    %c0_27 = arith.constant 0 : index
    %c0_28 = arith.constant 0 : index
    %43 = vector.load %arg7[%c0_25, %c0_26, %c0_27, %c0_28] : memref<2x3x128x128xbf16, #tpu.memory_space<vmem>>, vector<1x1x128x128xbf16>
    %44 = vector.shape_cast %43 : vector<1x1x128x128xbf16> to vector<128x128xbf16>
    %cst_29 = arith.constant dense<0.000000e+00> : vector<32x128xf32>
    %45 = tpu.matmul %42, %44, %cst_29 {dimension_numbers = #tpu.dot_dimension_numbers<[1], [0], [0], [1], [0, 0, 1, 1], [], []>} : vector<32x128xbf16>, vector<128x128xbf16>, vector<32x128xf32> -> vector<32x128xf32>
    %46 = arith.addf %38, %45 : vector<32x128xf32>
    %c1 = arith.constant 1 : index
    %c0_30 = arith.constant 0 : index
    %c0_31 = arith.constant 0 : index
    %47 = vector.load %arg6[%c1, %c0_30, %c0_31] : memref<3x32x32xbf16, #tpu.memory_space<vmem>>, vector<1x32x32xbf16>
    %48 = vector.shape_cast %47 : vector<1x32x32xbf16> to vector<32x32xbf16>
    %cst_32 = arith.constant dense<0.000000e+00> : vector<32x128xf32>
    %49 = tpu.matmul %48, %31, %cst_32 {dimension_numbers = #tpu.dot_dimension_numbers<[1], [0], [0], [1], [0, 0, 1, 1], [], []>} : vector<32x32xbf16>, vector<32x128xbf16>, vector<32x128xf32> -> vector<32x128xf32>
    %50 = arith.truncf %49 : vector<32x128xf32> to vector<32x128xbf16>
    %c0_33 = arith.constant 0 : index
    %c1_34 = arith.constant 1 : index
    %c0_35 = arith.constant 0 : index
    %c0_36 = arith.constant 0 : index
    %51 = vector.load %arg7[%c0_33, %c1_34, %c0_35, %c0_36] : memref<2x3x128x128xbf16, #tpu.memory_space<vmem>>, vector<1x1x128x128xbf16>
    %52 = vector.shape_cast %51 : vector<1x1x128x128xbf16> to vector<128x128xbf16>
    %cst_37 = arith.constant dense<0.000000e+00> : vector<32x128xf32>
    %53 = tpu.matmul %50, %52, %cst_37 {dimension_numbers = #tpu.dot_dimension_numbers<[1], [0], [0], [1], [0, 0, 1, 1], [], []>} : vector<32x128xbf16>, vector<128x128xbf16>, vector<32x128xf32> -> vector<32x128xf32>
    %54 = arith.addf %46, %53 : vector<32x128xf32>
    %c2 = arith.constant 2 : index
    %c0_38 = arith.constant 0 : index
    %c0_39 = arith.constant 0 : index
    %55 = vector.load %arg6[%c2, %c0_38, %c0_39] : memref<3x32x32xbf16, #tpu.memory_space<vmem>>, vector<1x32x32xbf16>
    %56 = vector.shape_cast %55 : vector<1x32x32xbf16> to vector<32x32xbf16>
    %cst_40 = arith.constant dense<0.000000e+00> : vector<32x128xf32>
    %57 = tpu.matmul %56, %31, %cst_40 {dimension_numbers = #tpu.dot_dimension_numbers<[1], [0], [0], [1], [0, 0, 1, 1], [], []>} : vector<32x32xbf16>, vector<32x128xbf16>, vector<32x128xf32> -> vector<32x128xf32>
    %58 = arith.truncf %57 : vector<32x128xf32> to vector<32x128xbf16>
    %c0_41 = arith.constant 0 : index
    %c2_42 = arith.constant 2 : index
    %c0_43 = arith.constant 0 : index
    %c0_44 = arith.constant 0 : index
    %59 = vector.load %arg7[%c0_41, %c2_42, %c0_43, %c0_44] : memref<2x3x128x128xbf16, #tpu.memory_space<vmem>>, vector<1x1x128x128xbf16>
    %60 = vector.shape_cast %59 : vector<1x1x128x128xbf16> to vector<128x128xbf16>
    %cst_45 = arith.constant dense<0.000000e+00> : vector<32x128xf32>
    %61 = tpu.matmul %58, %60, %cst_45 {dimension_numbers = #tpu.dot_dimension_numbers<[1], [0], [0], [1], [0, 0, 1, 1], [], []>} : vector<32x128xbf16>, vector<128x128xbf16>, vector<32x128xf32> -> vector<32x128xf32>
    %62 = arith.addf %54, %61 : vector<32x128xf32>
    %cst_46 = arith.constant 0.000000e+00 : f32
    %63 = vector.broadcast %cst_46 : f32 to vector<32x128xf32>
    %64 = arith.maximumf %62, %63 : vector<32x128xf32>
    %65 = arith.addf %64, %30 : vector<32x128xf32>
    %66 = arith.truncf %65 : vector<32x128xf32> to vector<32x128xbf16>
    %c1_47 = arith.constant 1 : index
    %c0_48 = arith.constant 0 : index
    %c0_49 = arith.constant 0 : index
    %67 = vector.load %arg8[%c1_47, %c0_48, %c0_49] : memref<2x128x128xbf16, #tpu.memory_space<vmem>>, vector<1x128x128xbf16>
    %68 = vector.shape_cast %67 : vector<1x128x128xbf16> to vector<128x128xbf16>
    %cst_50 = arith.constant dense<0.000000e+00> : vector<32x128xf32>
    %69 = tpu.matmul %66, %68, %cst_50 {dimension_numbers = #tpu.dot_dimension_numbers<[1], [0], [0], [1], [0, 0, 1, 1], [], []>} : vector<32x128xbf16>, vector<128x128xbf16>, vector<32x128xf32> -> vector<32x128xf32>
    %c1_51 = arith.constant 1 : index
    %c0_52 = arith.constant 0 : index
    %c0_53 = arith.constant 0 : index
    %70 = vector.load %arg9[%c1_51, %c0_52, %c0_53] : memref<2x1x128xf32, #tpu.memory_space<vmem>>, vector<1x1x128xf32>
    %71 = vector.shape_cast %70 : vector<1x1x128xf32> to vector<1x128xf32>
    %72 = vector.broadcast %71 : vector<1x128xf32> to vector<32x128xf32>
    %73 = arith.addf %69, %72 : vector<32x128xf32>
    %c0_54 = arith.constant 0 : index
    %c0_55 = arith.constant 0 : index
    %c0_56 = arith.constant 0 : index
    %74 = vector.load %arg6[%c0_54, %c0_55, %c0_56] : memref<3x32x32xbf16, #tpu.memory_space<vmem>>, vector<1x32x32xbf16>
    %75 = vector.shape_cast %74 : vector<1x32x32xbf16> to vector<32x32xbf16>
    %cst_57 = arith.constant dense<0.000000e+00> : vector<32x128xf32>
    %76 = tpu.matmul %75, %66, %cst_57 {dimension_numbers = #tpu.dot_dimension_numbers<[1], [0], [0], [1], [0, 0, 1, 1], [], []>} : vector<32x32xbf16>, vector<32x128xbf16>, vector<32x128xf32> -> vector<32x128xf32>
    %77 = arith.truncf %76 : vector<32x128xf32> to vector<32x128xbf16>
    %c1_58 = arith.constant 1 : index
    %c0_59 = arith.constant 0 : index
    %c0_60 = arith.constant 0 : index
    %c0_61 = arith.constant 0 : index
    %78 = vector.load %arg7[%c1_58, %c0_59, %c0_60, %c0_61] : memref<2x3x128x128xbf16, #tpu.memory_space<vmem>>, vector<1x1x128x128xbf16>
    %79 = vector.shape_cast %78 : vector<1x1x128x128xbf16> to vector<128x128xbf16>
    %cst_62 = arith.constant dense<0.000000e+00> : vector<32x128xf32>
    %80 = tpu.matmul %77, %79, %cst_62 {dimension_numbers = #tpu.dot_dimension_numbers<[1], [0], [0], [1], [0, 0, 1, 1], [], []>} : vector<32x128xbf16>, vector<128x128xbf16>, vector<32x128xf32> -> vector<32x128xf32>
    %81 = arith.addf %73, %80 : vector<32x128xf32>
    %c1_63 = arith.constant 1 : index
    %c0_64 = arith.constant 0 : index
    %c0_65 = arith.constant 0 : index
    %82 = vector.load %arg6[%c1_63, %c0_64, %c0_65] : memref<3x32x32xbf16, #tpu.memory_space<vmem>>, vector<1x32x32xbf16>
    %83 = vector.shape_cast %82 : vector<1x32x32xbf16> to vector<32x32xbf16>
    %cst_66 = arith.constant dense<0.000000e+00> : vector<32x128xf32>
    %84 = tpu.matmul %83, %66, %cst_66 {dimension_numbers = #tpu.dot_dimension_numbers<[1], [0], [0], [1], [0, 0, 1, 1], [], []>} : vector<32x32xbf16>, vector<32x128xbf16>, vector<32x128xf32> -> vector<32x128xf32>
    %85 = arith.truncf %84 : vector<32x128xf32> to vector<32x128xbf16>
    %c1_67 = arith.constant 1 : index
    %c1_68 = arith.constant 1 : index
    %c0_69 = arith.constant 0 : index
    %c0_70 = arith.constant 0 : index
    %86 = vector.load %arg7[%c1_67, %c1_68, %c0_69, %c0_70] : memref<2x3x128x128xbf16, #tpu.memory_space<vmem>>, vector<1x1x128x128xbf16>
    %87 = vector.shape_cast %86 : vector<1x1x128x128xbf16> to vector<128x128xbf16>
    %cst_71 = arith.constant dense<0.000000e+00> : vector<32x128xf32>
    %88 = tpu.matmul %85, %87, %cst_71 {dimension_numbers = #tpu.dot_dimension_numbers<[1], [0], [0], [1], [0, 0, 1, 1], [], []>} : vector<32x128xbf16>, vector<128x128xbf16>, vector<32x128xf32> -> vector<32x128xf32>
    %89 = arith.addf %81, %88 : vector<32x128xf32>
    %c2_72 = arith.constant 2 : index
    %c0_73 = arith.constant 0 : index
    %c0_74 = arith.constant 0 : index
    %90 = vector.load %arg6[%c2_72, %c0_73, %c0_74] : memref<3x32x32xbf16, #tpu.memory_space<vmem>>, vector<1x32x32xbf16>
    %91 = vector.shape_cast %90 : vector<1x32x32xbf16> to vector<32x32xbf16>
    %cst_75 = arith.constant dense<0.000000e+00> : vector<32x128xf32>
    %92 = tpu.matmul %91, %66, %cst_75 {dimension_numbers = #tpu.dot_dimension_numbers<[1], [0], [0], [1], [0, 0, 1, 1], [], []>} : vector<32x32xbf16>, vector<32x128xbf16>, vector<32x128xf32> -> vector<32x128xf32>
    %93 = arith.truncf %92 : vector<32x128xf32> to vector<32x128xbf16>
    %c1_76 = arith.constant 1 : index
    %c2_77 = arith.constant 2 : index
    %c0_78 = arith.constant 0 : index
    %c0_79 = arith.constant 0 : index
    %94 = vector.load %arg7[%c1_76, %c2_77, %c0_78, %c0_79] : memref<2x3x128x128xbf16, #tpu.memory_space<vmem>>, vector<1x1x128x128xbf16>
    %95 = vector.shape_cast %94 : vector<1x1x128x128xbf16> to vector<128x128xbf16>
    %cst_80 = arith.constant dense<0.000000e+00> : vector<32x128xf32>
    %96 = tpu.matmul %93, %95, %cst_80 {dimension_numbers = #tpu.dot_dimension_numbers<[1], [0], [0], [1], [0, 0, 1, 1], [], []>} : vector<32x128xbf16>, vector<128x128xbf16>, vector<32x128xf32> -> vector<32x128xf32>
    %97 = arith.addf %89, %96 : vector<32x128xf32>
    %cst_81 = arith.constant 0.000000e+00 : f32
    %98 = vector.broadcast %cst_81 : f32 to vector<32x128xf32>
    %99 = arith.maximumf %97, %98 : vector<32x128xf32>
    %100 = arith.addf %99, %65 : vector<32x128xf32>
    %c0_82 = arith.constant 0 : index
    %c0_83 = arith.constant 0 : index
    %101 = vector.load %arg11[%c0_82, %c0_83] : memref<32x128xf32, #tpu.memory_space<vmem>>, vector<32x128xf32>
    tpu.vector_store %arg11[%c0_82, %c0_83], %100 {strides = array<i32>} : memref<32x128xf32, #tpu.memory_space<vmem>>, vector<32x128xf32>,
    %c0_84 = arith.constant 0 : index
    %c0_85 = arith.constant 0 : index
    %102 = vector.load %arg10[%c0_84, %c0_85] : memref<2x32xf32, #tpu.memory_space<vmem>>, vector<2x32xf32>
    %cst_86 = arith.constant dense<0.000000e+00> : vector<2x128xf32>
    %103 = tpu.matmul %102, %100, %cst_86 {dimension_numbers = #tpu.dot_dimension_numbers<[1], [0], [0], [1], [0, 0, 1, 1], [], []>} : vector<2x32xf32>, vector<32x128xf32>, vector<2x128xf32> -> vector<2x128xf32>
    %c0_87 = arith.constant 0 : index
    %c0_88 = arith.constant 0 : index
    %104 = vector.load %arg12[%c0_87, %c0_88] : memref<2x128xf32, #tpu.memory_space<vmem>>, vector<2x128xf32>
    tpu.vector_store %arg12[%c0_87, %c0_88], %103 {strides = array<i32>} : memref<2x128xf32, #tpu.memory_space<vmem>>, vector<2x128xf32>,
    return
  }
  func.func @transform_0(%arg0: i32) -> (i32, i32) {
    %c0_i32 = arith.constant 0 : i32
    %c0_i32_0 = arith.constant 0 : i32
    %c0_i32_1 = arith.constant 0 : i32
    return %c0_i32, %c0_i32_0 : i32, i32
  }
  func.func @transform_1(%arg0: i32) -> (i32, i32) {
    %c0_i32 = arith.constant 0 : i32
    %c0_i32_0 = arith.constant 0 : i32
    %c0_i32_1 = arith.constant 0 : i32
    return %c0_i32, %c0_i32_0 : i32, i32
  }
  func.func @transform_2(%arg0: i32) -> (i32, i32) {
    %c0_i32 = arith.constant 0 : i32
    %c0_i32_0 = arith.constant 0 : i32
    %c0_i32_1 = arith.constant 0 : i32
    return %c0_i32, %c0_i32_0 : i32, i32
  }
  func.func @transform_3(%arg0: i32) -> (i32, i32) {
    %c0_i32 = arith.constant 0 : i32
    %c0_i32_0 = arith.constant 0 : i32
    %c0_i32_1 = arith.constant 0 : i32
    return %c0_i32, %c0_i32_0 : i32, i32
  }
  func.func @transform_4(%arg0: i32) -> (i32, i32) {
    %c0_i32 = arith.constant 0 : i32
    %c0_i32_0 = arith.constant 0 : i32
    %c0_i32_1 = arith.constant 0 : i32
    return %c0_i32, %c0_i32_0 : i32, i32
  }
  func.func @transform_5(%arg0: i32) -> (i32, i32, i32) {
    %c0_i32 = arith.constant 0 : i32
    %c0_i32_0 = arith.constant 0 : i32
    %c0_i32_1 = arith.constant 0 : i32
    %c0_i32_2 = arith.constant 0 : i32
    return %c0_i32, %c0_i32_0, %c0_i32_1 : i32, i32, i32
  }
  func.func @transform_6(%arg0: i32) -> (i32, i32, i32, i32) {
    %c0_i32 = arith.constant 0 : i32
    %c0_i32_0 = arith.constant 0 : i32
    %c0_i32_1 = arith.constant 0 : i32
    %c0_i32_2 = arith.constant 0 : i32
    %c0_i32_3 = arith.constant 0 : i32
    return %c0_i32, %c0_i32_0, %c0_i32_1, %c0_i32_2 : i32, i32, i32, i32
  }
  func.func @transform_7(%arg0: i32) -> (i32, i32, i32) {
    %c0_i32 = arith.constant 0 : i32
    %c0_i32_0 = arith.constant 0 : i32
    %c0_i32_1 = arith.constant 0 : i32
    %c0_i32_2 = arith.constant 0 : i32
    return %c0_i32, %c0_i32_0, %c0_i32_1 : i32, i32, i32
  }
  func.func @transform_8(%arg0: i32) -> (i32, i32, i32) {
    %c0_i32 = arith.constant 0 : i32
    %c0_i32_0 = arith.constant 0 : i32
    %c0_i32_1 = arith.constant 0 : i32
    %c0_i32_2 = arith.constant 0 : i32
    return %c0_i32, %c0_i32_0, %c0_i32_1 : i32, i32, i32
  }
  func.func @transform_9(%arg0: i32) -> (i32, i32) {
    %c0_i32 = arith.constant 0 : i32
    %c0_i32_0 = arith.constant 0 : i32
    %c0_i32_1 = arith.constant 0 : i32
    return %c0_i32, %c0_i32_0 : i32, i32
  }
  func.func @transform_10(%arg0: i32) -> (i32, i32) {
    %c0_i32 = arith.constant 0 : i32
    %c0_i32_0 = arith.constant 0 : i32
    %c0_i32_1 = arith.constant 0 : i32
    return %c0_i32, %c0_i32_0 : i32, i32
  }
  func.func @transform_11(%arg0: i32) -> (i32, i32) {
    %c0_i32 = arith.constant 0 : i32
    %c0_i32_0 = arith.constant 0 : i32
    %c0_i32_1 = arith.constant 0 : i32
    return %c0_i32, %c0_i32_0 : i32, i32
  }
}

</mosaic_0001>

<bundles_post_ra>
// kernel: tpu_custom_call.1
= control target key start
LH: loop header
LB: loop body
LE: loop exit
PB: predicated region body
PF: predicated region fallthrough
CT: control target
= control target key end

     0   :  { %17 = vsyncpa [#allocation3], 0  ;;  %s2545_s0 = inlined_call_operand.vmem [shape: f32[32,16], index: 0, kind: input, shape index: {}]   ;;  %s2546_s1 = inlined_call_operand.vmem [shape: bf16[16,128], index: 1, kind: input, shape index: {}]   ;;  %s2547_s2 = inlined_call_operand.vmem [shape: f32[1,128], index: 2, kind: input, shape index: {}]   ;;  %s2548_s3 = inlined_call_operand.vmem [shape: f32[1,128], index: 3, kind: input, shape index: {}]   ;;  %s2549_s4 = inlined_call_operand.vmem [shape: f32[1,128], index: 4, kind: input, shape index: {}]   ;;  %s2550_s5 = inlined_call_operand.vmem [shape: bf16[3,32,32], index: 5, kind: input, shape index: {}]   ;;  %s2551_s6 = inlined_call_operand.hbm [shape: bf16[2,3,128,128], index: 6, kind: input, shape index: {}]   ;;  %s2552_s7 = inlined_call_operand.hbm [shape: bf16[2,128,128], index: 7, kind: input, shape index: {}]   ;;  %s2553_s8 = inlined_call_operand.vmem [shape: f32[2,1,128], index: 8, kind: input, shape index: {}]   ;;  %s2554_s9 = inlined_call_operand.vmem [shape: f32[2,32], index: 9, kind: input, shape index: {}]   ;;  %s2555_s10 = inlined_call_operand.hbm [shape: f32[32,128], index: 10, kind: output, shape index: {0}]   ;;  %s2556_s11 = inlined_call_operand.hbm [shape: f32[2,128], index: 11, kind: output, shape index: {1}]  }
   0x1   :  { %18 = vsyncpa [#allocation6], 0 }
   0x2   :  { %19 = vsyncpa [#allocation4], 0 }
   0x3   :  { %20 = vsyncpa [#allocation9], 0  ;;  %s2306_s17 = smov [#allocation2]   ;;  %s2210_s21 = scalar_lea.hbm %s2551_s6, 6144 }
   0x4   :  { %s38_s18 = sshll.u32 %s2306_s17, 4  ;;  %p2211_p0 = scmp.ne.s32.totalorder %s2551_s6, %s2210_s21  ;;  %s39_s18 = int_to_ptr.vmem [resolvable:$true] %s38_s18 }
   0x5   :  { %p2214_p1 = scmp.lt.u32.totalorder %s2210_s21, %s2551_s6 }
   0x7   :  { %p2216_p2 = pnand %p2214_p1, %p2211_p0 }
   0x9   :  { %2219 = shalt.err (!%p2216_p2)
}
   0xa   :  { %s2220_s26 = scalar_lea.vmem %s39_s18, 6144  ;;  %p2225_p4 = scmp.lt.s32.totalorder %s39_s18, %s39_s18 }
   0xb   :  { %p2221_p3 = scmp.ne.s32.totalorder %s39_s18, %s2220_s26  ;;  %p2226_p5 = scmp.lt.s32.totalorder %s2220_s26, %s2220_s26 }
   0xd   :  { %p2227_p6 = por %p2226_p5, %p2225_p4 }
   0xf   :  { %p2228_p7 = pnand %p2227_p6, %p2221_p3 }
  0x11   :  { %2231 = shalt.err (!%p2228_p7)
}
  0x12   :  { %s2307_s27 = smov 64   ;;  %s2308_s28 = smov 4  }
  0x13   :  { %44 = dma.hbm_to_vmem [thread:$0]  %s2551_s6, 6144, %s39_s18, [#allocation3], %s2307_s27, %s2307_s27, %s2308_s28  }
  0x14   :  { %s2309_s12 = smov [#allocation5]   ;;  %s2232_s16 = scalar_lea.hbm %s2552_s7, 2048 }
  0x15   :  { %s50_s13 = sshll.u32 %s2309_s12, 4  ;;  %p2233_p8 = scmp.ne.s32.totalorder %s2552_s7, %s2232_s16  ;;  %s51_s13 = int_to_ptr.vmem [resolvable:$true] %s50_s13 }
  0x16   :  { %p2236_p9 = scmp.lt.u32.totalorder %s2232_s16, %s2552_s7 }
  0x18   :  { %p2238_p10 = pnand %p2236_p9, %p2233_p8 }
  0x1a   :  { %2241 = shalt.err (!%p2238_p10)
}
  0x1b   :  { %s2242_s22 = scalar_lea.vmem %s51_s13, 2048  ;;  %p2247_p12 = scmp.lt.s32.totalorder %s51_s13, %s51_s13 }
  0x1c   :  { %p2243_p11 = scmp.ne.s32.totalorder %s51_s13, %s2242_s22  ;;  %p2248_p13 = scmp.lt.s32.totalorder %s2242_s22, %s2242_s22 }
  0x1e   :  { %p2249_p0 = por %p2248_p13, %p2247_p12 }
  0x20   :  { %p2250_p1 = pnand %p2249_p0, %p2243_p11 }
  0x22   :  { %2253 = shalt.err (!%p2250_p1)
}
  0x23   :  { %56 = dma.hbm_to_vmem [thread:$0]  %s2552_s7, 2048, %s51_s13, [#allocation6], %s2307_s27, %s2307_s27, %s2308_s28  }
  0x24   :  { %2298 = dma.done.wait [#allocation3], 6144  }
  0x25   :  { %2299 = vsyncadd [#allocation3], 4294961152 }
  0x26   :  { %2300 = dma.done.wait [#allocation6], 2048  }
  0x27   :  { %2301 = vsyncadd [#allocation6], 4294965248  ;;  %v2137_v0 = vld [vmem:[%s2546_s1] sm:$0xff]   ;;  %v69_v2 = vld [vmem:[%s2545_s0 + $0x8] sm:$0xff]  ;;  %vm89_vm0 = vcmask 130048   ;;  %vm338_vm1 = vcmask 261120  }
  0x28   :  { %v68_v1 = vld [vmem:[%s2545_s0] sm:$0xff]  ;;  %v70_v3 = vld [vmem:[%s2545_s0 + $0x10] sm:$0xff]  ;;  %1863 = vmatprep.subr.bf16.mxu0 %v2137_v0  ;;  %v71_v5 = vld [vmem:[%s2545_s0 + $0x18] sm:$0xff]  ;;  %vm2311_vm2 = vmmov 0   ;;  %s2313_s12 = smov [#allocation7]  }
  0x29   :  { %v72_v4 = vpack.c.bf16 %v69_v2, %v68_v1  ;;  %1864 = vmatpush3.bf16.msra.mxu0 %v2137_v0  ;;  %v73_v6 = vpack.c.bf16 %v71_v5, %v70_v3  ;;  %v2138_v7 = vld [vmem:[#allocation5] sm:$0xff]   ;;  %v2139_v8 = vld [vmem:[#allocation5 + $0x8] sm:$0xff]   ;;  %v2140_v9 = vld [vmem:[#allocation5 + $0x10] sm:$0xff]   ;;  %s1624_s14 = sshll.u32 %s2313_s12, 4  ;;  %s1625_s14 = int_to_ptr.vmem [resolvable:$true] %s1624_s14 }
  0x2a   :  { %1869 = vmatprep.subr.bf16.mxu1 %v2138_v7  ;;  %v2141_v10 = vld [vmem:[#allocation5 + $0x18] sm:$0xff]   ;;  %v2142_v11 = vld [vmem:[#allocation5 + $0x20] sm:$0xff]   ;;  %v2143_v12 = vld [vmem:[#allocation5 + $0x28] sm:$0xff]   ;;  %s2254_s7 = scalar_lea.vmem %s1625_s14, 512  ;;  %p2259_p3 = scmp.lt.s32.totalorder %s1625_s14, %s1625_s14 }
  0x2b   :  { %1865 = vmatprep.mubr.msk.bf16.mxu0 %vm89_vm0, %v72_v4  ;;  %1870 = vmatpush3.bf16.msra.mxu1 %v2138_v7  ;;  %v2144_v13 = vld [vmem:[#allocation5 + $0x30] sm:$0xff]   ;;  %v2145_v14 = vld [vmem:[#allocation5 + $0x38] sm:$0xff]   ;;  %v2147_v7 = vld [vmem:[#allocation2] sm:$0xff]   ;;  %p2255_p2 = scmp.ne.s32.totalorder %s1625_s14, %s2254_s7  ;;  %p2260_p4 = scmp.lt.s32.totalorder %s2254_s7, %s2254_s7 }
  0x2c   :  { %1866 = vmatmul.mubr.msk.bf16.vlgmr.msra.gmra.mrb[0].mxu0 %vm89_vm0, %v73_v6  ;;  %1871 = vmatprep.subr.bf16.mxu1 %v2139_v8  ;;  %v1651_v16 = vld [vmem:[%s2547_s2] ss:$0 sm:$0xff] }
  0x2d   :  { %v1655_v54 = vld [vmem:[%s2548_s3] ss:$0 sm:$0xff]  ;;  %p2261_p5 = por %p2260_p4, %p2259_p3 }
  0x2e   :  { %v1656_v59 = vld [vmem:[%s2549_s4] ss:$0 sm:$0xff] }
  0x2f   :  { %1872 = vmatpush3.bf16.msra.mxu1 %v2139_v8  ;;  %v2440_v6 = vld [vmem:[%s2550_s5] sm:$0xff]   ;;  %v2447_v8 = vld [vmem:[%s2550_s5 + $0x8] sm:$0xff]   ;;  %p2262_p6 = pnand %p2261_p5, %p2255_p2 }
  0x30   :  { %1873 = vmatprep.subr.bf16.mxu1 %v2140_v9 }
  0x33   :  { %1874 = vmatpush3.bf16.msra.mxu1 %v2140_v9  ;;  %v2149_v9 = vld [vmem:[#allocation2 + $0x8] sm:$0xff]  }
  0x34   :  { %1875 = vmatprep.subr.bf16.mxu1 %v2141_v10 }
  0x37   :  { %1876 = vmatpush3.bf16.msra.mxu1 %v2141_v10  ;;  %v2150_v10 = vld [vmem:[#allocation2 + $0x10] sm:$0xff]  }
  0x38   :  { %1877 = vmatprep.subr.bf16.mxu1 %v2142_v11 }
  0x3b   :  { %1878 = vmatpush3.bf16.msra.mxu1 %v2142_v11  ;;  %v2151_v11 = vld [vmem:[#allocation2 + $0x18] sm:$0xff]  }
  0x3c   :  { %1879 = vmatprep.subr.bf16.mxu1 %v2143_v12 }
  0x3f   :  { %1880 = vmatpush3.bf16.msra.mxu1 %v2143_v12  ;;  %v2152_v12 = vld [vmem:[#allocation2 + $0x20] sm:$0xff]  }
  0x40   :  { %1881 = vmatprep.subr.bf16.mxu1 %v2144_v13 }
  0x43   :  { %1882 = vmatpush3.bf16.msra.mxu1 %v2144_v13  ;;  %v2153_v13 = vld [vmem:[#allocation2 + $0x28] sm:$0xff]  }
  0x44   :  { %1883 = vmatprep.subr.bf16.mxu1 %v2145_v14 }
  0x47   :  { %1884 = vmatpush3.bf16.msra.mxu1 %v2145_v14  ;;  %v2154_v14 = vld [vmem:[#allocation2 + $0x30] sm:$0xff]  }
  0xff   :  { %v1867_v15 = vpop.f32.mrb[0].mxu0 }
 0x100   :  { %v130_v17 = vpop.f32.mrb[1].mxu0  ;;  %v139_v22 = vadd.f32 %v1867_v15, %v1651_v16  ;;  %v2155_v15 = vld [vmem:[#allocation2 + $0x38] sm:$0xff]  }
 0x101   :  { %v1868_v18 = vpop.f32.mrb[2].mxu0  ;;  %v131_v20 = vadd.f32 %v1651_v16, %v130_v17  ;;  %v2459_v17 = vld [vmem:[%s2550_s5 + $0x28] sm:$0xff]  }
 0x102   :  { %v133_v19 = vpop.f32.mrb[3].mxu0  ;;  %v142_v24 = vadd.f32 %v1868_v18, %v1651_v16 }
 0x103   :  { %v134_v21 = vadd.f32 %v1651_v16, %v133_v19  ;;  %v2454_v16 = vld [vmem:[%s2550_s5 + $0x20] sm:$0xff]  }
 0x104   :  { %1949 = vmatprep.mubr.msk.bf16.mxu0 %vm338_vm1, %v2454_v16 }
 0x105   :  { %v145_v23 = vadd.f32 %v134_v21, %v131_v20 }
 0x107   :  { %v146_v25 = vadd.f32 %v145_v23, %v139_v22 }
 0x109   :  { %v147_v26 = vadd.f32 %v146_v25, %v142_v24  ;;  %v2160_v25 = vld [vmem:[#allocation2 + $0x40] sm:$0xff]  }
 0x10b   :  { %v148_v27 = vrot.slane %v147_v26, 4 }
 0x10d   :  { %v149_v28 = vadd.f32 %v148_v27, %v147_v26  ;;  %v2475_v26 = vld [vmem:[%s2550_s5 + $0x18] sm:$0xff]  }
 0x10e   :  { %v2161_v27 = vld [vmem:[#allocation2 + $0x48] sm:$0xff]  }
 0x10f   :  { %v150_v29 = vrot.slane %v149_v28, 2 }
 0x111   :  { %v151_v30 = vadd.f32 %v150_v29, %v149_v28  ;;  %v2162_v28 = vld [vmem:[#allocation2 + $0x50] sm:$0xff]   ;;  %v2163_v29 = vld [vmem:[#allocation2 + $0x58] sm:$0xff]  }
 0x113   :  { %v152_v31 = vrot.slane %v151_v30, 1 }
 0x115   :  { %v153_v32 = vadd.f32 %v152_v31, %v151_v30  ;;  %v2164_v30 = vld [vmem:[#allocation2 + $0x60] sm:$0xff]   ;;  %v2165_v31 = vld [vmem:[#allocation2 + $0x68] sm:$0xff]  }
 0x117   :  { %v155_v33 = vmul.f32 0.03125, %v153_v32  ;;  %v2166_v32 = vld [vmem:[#allocation2 + $0x70] sm:$0xff]  }
 0x119   :  { %v156_v34 = vsub.f32 %v131_v20, %v155_v33  ;;  %v157_v35 = vsub.f32 %v134_v21, %v155_v33  ;;  %v158_v36 = vsub.f32 %v139_v22, %v155_v33  ;;  %v159_v37 = vsub.f32 %v142_v24, %v155_v33  ;;  %v2468_v24 = vld [vmem:[%s2550_s5 + $0x10] sm:$0xff]   ;;  %v2167_v33 = vld [vmem:[#allocation2 + $0x78] sm:$0xff]  }
 0x11b   :  { %v160_v38 = vmul.f32 %v156_v34, %v156_v34  ;;  %v161_v39 = vmul.f32 %v157_v35, %v157_v35  ;;  %v162_v40 = vmul.f32 %v158_v36, %v158_v36  ;;  %v163_v42 = vmul.f32 %v159_v37, %v159_v37 }
 0x11d   :  { %v164_v41 = vadd.f32 %v161_v39, %v160_v38 }
 0x11f   :  { %v165_v43 = vadd.f32 %v164_v41, %v162_v40  ;;  %v2176_v41 = vld [vmem:[#allocation5 + $0x40] sm:$0xff]  }
 0x121   :  { %v166_v44 = vadd.f32 %v165_v43, %v163_v42  ;;  %v2177_v42 = vld [vmem:[#allocation5 + $0x48] sm:$0xff]   ;;  %v2178_v43 = vld [vmem:[#allocation5 + $0x50] sm:$0xff]  }
 0x123   :  { %v167_v45 = vrot.slane %v166_v44, 4 }
 0x125   :  { %v168_v46 = vadd.f32 %v167_v45, %v166_v44  ;;  %v2179_v44 = vld [vmem:[#allocation5 + $0x58] sm:$0xff]   ;;  %v2180_v45 = vld [vmem:[#allocation5 + $0x60] sm:$0xff]  }
 0x127   :  { %v169_v47 = vrot.slane %v168_v46, 2 }
 0x129   :  { %v170_v48 = vadd.f32 %v169_v47, %v168_v46 }
 0x12b   :  { %v171_v49 = vrot.slane %v170_v48, 1 }
 0x12d   :  { %v172_v50 = vadd.f32 %v171_v49, %v170_v48 }
 0x12f   :  { %v173_v51 = vmul.f32 0.03125, %v172_v50 }
 0x131   :  { %v174_v52 = vadd.f32 1e-05, %v173_v51 }
 0x133   :  { %2208 = vrsqrt.f32 %v174_v52  ;;  %v2169_v52 = vld [vmem:[#allocation2 + $0x88] sm:$0xff]  }
 0x13d   :  { %v2209_v53 = vpop.eup %2208 }
 0x13e   :  { %v176_v55 = vmul.f32 %v2209_v53, %v156_v34  ;;  %v177_v56 = vmul.f32 %v2209_v53, %v157_v35  ;;  %v178_v57 = vmul.f32 %v2209_v53, %v158_v36  ;;  %v179_v58 = vmul.f32 %v2209_v53, %v159_v37  ;;  %v2168_v34 = vld [vmem:[#allocation2 + $0x80] sm:$0xff]   ;;  %v2170_v53 = vld [vmem:[#allocation2 + $0x90] sm:$0xff]  }
 0x140   :  { %v187_v60 = vmul.f32 %v1655_v54, %v176_v55  ;;  %v188_v61 = vmul.f32 %v1655_v54, %v177_v56  ;;  %v189_v62 = vmul.f32 %v1655_v54, %v178_v57  ;;  %v190_v63 = vmul.f32 %v1655_v54, %v179_v58  ;;  %v2171_v54 = vld [vmem:[#allocation2 + $0x98] sm:$0xff]   ;;  %v2172_v55 = vld [vmem:[#allocation2 + $0xa0] sm:$0xff]   ;;  %v2173_v56 = vld [vmem:[#allocation2 + $0xa8] sm:$0xff]  }
 0x141   :  { %v2174_v57 = vld [vmem:[#allocation2 + $0xb0] sm:$0xff]   ;;  %v2175_v58 = vld [vmem:[#allocation2 + $0xb8] sm:$0xff]  }
 0x142   :  { %v2425_v0 = vadd.f32 %v1656_v59, %v187_v60  ;;  %v2427_v1 = vadd.f32 %v1656_v59, %v188_v61  ;;  %v2429_v2 = vadd.f32 %v1656_v59, %v189_v62  ;;  %v2431_v3 = vadd.f32 %v1656_v59, %v190_v63  ;;  %v2181_v59 = vld [vmem:[#allocation5 + $0x68] sm:$0xff]   ;;  %v2182_v60 = vld [vmem:[#allocation5 + $0x70] sm:$0xff]   ;;  %v2183_v61 = vld [vmem:[#allocation5 + $0x78] sm:$0xff]  }
 0x143   :  { %v1657_v62 = vld [vmem:[%s2553_s8] ss:$0 sm:$0xff] }
 0x144   :  { %v202_v4 = vpack.c.bf16 %v2427_v1, %v2425_v0  ;;  %v203_v5 = vpack.c.bf16 %v2431_v3, %v2429_v2 }
 0x146   :  { %1885 = vmatprep.mubr.bf16.mxu1 %v202_v4  ;;  %1889 = vmatprep.subr.bf16.mxu1 %v202_v4 }
 0x147   :  { %1945 = vmatprep.subr.bf16.mxu0 %v202_v4  ;;  %1886 = vmatmul.mubr.bf16.vlgmr.msra.gmra.mrb[0].mxu1 %v203_v5 }
 0x148   :  { %1890 = vmatpush3.bf16.msra.mxu1 %v202_v4  ;;  %1946 = vmatpush3.bf16.msra.mxu0 %v202_v4 }
 0x149   :  { %1891 = vmatprep.subr.bf16.mxu1 %v203_v5  ;;  %1947 = vmatprep.subr.bf16.mxu0 %v203_v5 }
 0x14a   :  { %1893 = vmatprep.mubr.msk.bf16.mxu1 %vm338_vm1, %v2440_v6 }
 0x14c   :  { %1892 = vmatpush3.bf16.msra.mxu1 %v203_v5  ;;  %1948 = vmatpush3.bf16.msra.mxu0 %v203_v5 }
 0x14d   :  { %1897 = vmatprep.subr.bf16.mxu1 %v2147_v7  ;;  %1973 = vmatprep.subr.bf16.mxu0 %v2176_v41 }
 0x14f   :  { %1894 = vmatmul.mubr.msk.bf16.vlgmr.msra.gmra.mrb[4].mxu1 %vm338_vm1, %v2447_v8  ;;  %1950 = vmatmul.mubr.msk.bf16.vlgmr.msra.gmra.mrb[4].mxu0 %vm338_vm1, %v2459_v17 }
 0x150   :  { %1898 = vmatpush3.bf16.msra.mxu1 %v2147_v7  ;;  %1974 = vmatpush3.bf16.msra.mxu0 %v2176_v41 }
 0x151   :  { %1899 = vmatprep.subr.bf16.mxu1 %v2149_v9  ;;  %1975 = vmatprep.subr.bf16.mxu0 %v2177_v42 }
 0x154   :  { %1900 = vmatpush3.bf16.msra.mxu1 %v2149_v9  ;;  %1976 = vmatpush3.bf16.msra.mxu0 %v2177_v42 }
 0x155   :  { %1901 = vmatprep.subr.bf16.mxu1 %v2150_v10  ;;  %1977 = vmatprep.subr.bf16.mxu0 %v2178_v43 }
 0x158   :  { %1902 = vmatpush3.bf16.msra.mxu1 %v2150_v10  ;;  %1978 = vmatpush3.bf16.msra.mxu0 %v2178_v43 }
 0x159   :  { %1903 = vmatprep.subr.bf16.mxu1 %v2151_v11  ;;  %1979 = vmatprep.subr.bf16.mxu0 %v2179_v44 }
 0x15c   :  { %1904 = vmatpush3.bf16.msra.mxu1 %v2151_v11  ;;  %1980 = vmatpush3.bf16.msra.mxu0 %v2179_v44 }
 0x15d   :  { %1905 = vmatprep.subr.bf16.mxu1 %v2152_v12  ;;  %1981 = vmatprep.subr.bf16.mxu0 %v2180_v45 }
 0x160   :  { %1906 = vmatpush3.bf16.msra.mxu1 %v2152_v12  ;;  %1982 = vmatpush3.bf16.msra.mxu0 %v2180_v45 }
 0x161   :  { %1907 = vmatprep.subr.bf16.mxu1 %v2153_v13  ;;  %1983 = vmatprep.subr.bf16.mxu0 %v2181_v59 }
 0x164   :  { %1908 = vmatpush3.bf16.msra.mxu1 %v2153_v13  ;;  %1984 = vmatpush3.bf16.msra.mxu0 %v2181_v59  ;;  %v2310_v59 = vmov 0.0|0.0  }
 0x165   :  { %1909 = vmatprep.subr.bf16.mxu1 %v2154_v14  ;;  %1985 = vmatprep.subr.bf16.mxu0 %v2182_v60 }
 0x168   :  { %1910 = vmatpush3.bf16.msra.mxu1 %v2154_v14  ;;  %1986 = vmatpush3.bf16.msra.mxu0 %v2182_v60  ;;  %v2312_v60 = vmov 0.0  }
 0x169   :  { %1911 = vmatprep.subr.bf16.mxu1 %v2155_v15  ;;  %1987 = vmatprep.subr.bf16.mxu0 %v2183_v61 }
 0x16c   :  { %1912 = vmatpush3.bf16.msra.mxu1 %v2155_v15  ;;  %1988 = vmatpush3.bf16.msra.mxu0 %v2183_v61  ;;  %v1711_v61 = vld [vmem:[%s2553_s8 + $0x1] ss:$0 sm:$0xff] }
 0x16d   :  { %1917 = vmatprep.subr.bf16.mxu1 %v202_v4 }
 0x222   :  { %v1895_v18 = vpop.f32.mrb[4].mxu1  ;;  %v1951_v35 = vpop.f32.mrb[4].mxu0 }
 0x223   :  { %v379_v19 = vpop.f32.mrb[5].mxu1  ;;  %v758_v36 = vpop.f32.mrb[5].mxu0 }
 0x224   :  { %v1896_v20 = vpop.f32.mrb[6].mxu1  ;;  %v1952_v37 = vpop.f32.mrb[6].mxu0 }
 0x225   :  { %v395_v21 = vpack.c.bf16 %v1896_v20, %v1895_v18  ;;  %v382_v22 = vpop.f32.mrb[7].mxu1  ;;  %v774_v38 = vpack.c.bf16 %v1952_v37, %v1951_v35  ;;  %v761_v39 = vpop.f32.mrb[7].mxu0  ;;  %v2194_v35 = vld [vmem:[#allocation2 + $0x110] sm:$0xff]   ;;  %v2196_v37 = vld [vmem:[#allocation2 + $0x120] sm:$0xff]  }
 0x226   :  { %v394_v23 = vpack.c.bf16 %v382_v22, %v379_v19  ;;  %v773_v40 = vpack.c.bf16 %v761_v39, %v758_v36  ;;  %v2195_v36 = vld [vmem:[#allocation2 + $0x118] sm:$0xff]  }
 0x227   :  { %v2199_v39 = vld [vmem:[#allocation2 + $0x138] sm:$0xff]  }
 0x228   :  { %1913 = vmatprep.mubr.bf16.mxu1 %v394_v23 }
 0x229   :  { %1914 = vmatmul.mubr.bf16.vlgmr.msra.gmra.mrb[0].mxu1 %v395_v21 }
 0x22a   :  { %1918 = vmatpush3.bf16.msra.mxu1 %v202_v4  ;;  %1921 = vmatprep.mubr.msk.bf16.mxu1 %vm338_vm1, %v2468_v24 }
 0x22b   :  { %1919 = vmatprep.subr.bf16.mxu1 %v203_v5 }
 0x22e   :  { %1920 = vmatpush3.bf16.msra.mxu1 %v203_v5 }
 0x22f   :  { %1925 = vmatprep.subr.bf16.mxu1 %v2160_v25 }
 0x231   :  { %1922 = vmatmul.mubr.msk.bf16.vlgmr.msra.gmra.mrb[8].mxu1 %vm338_vm1, %v2475_v26 }
 0x232   :  { %1926 = vmatpush3.bf16.msra.mxu1 %v2160_v25  ;;  %v2188_v25 = vld [vmem:[#allocation2 + $0xe0] sm:$0xff]  }
 0x233   :  { %1927 = vmatprep.subr.bf16.mxu1 %v2161_v27 }
 0x236   :  { %1928 = vmatpush3.bf16.msra.mxu1 %v2161_v27  ;;  %v2190_v27 = vld [vmem:[#allocation2 + $0xf0] sm:$0xff]  }
 0x237   :  { %1929 = vmatprep.subr.bf16.mxu1 %v2162_v28 }
 0x23a   :  { %1930 = vmatpush3.bf16.msra.mxu1 %v2162_v28 }
 0x23b   :  { %1931 = vmatprep.subr.bf16.mxu1 %v2163_v29 }
 0x23e   :  { %1932 = vmatpush3.bf16.msra.mxu1 %v2163_v29 }
 0x23f   :  { %1933 = vmatprep.subr.bf16.mxu1 %v2164_v30 }
 0x242   :  { %1934 = vmatpush3.bf16.msra.mxu1 %v2164_v30 }
 0x243   :  { %1935 = vmatprep.subr.bf16.mxu1 %v2165_v31 }
 0x246   :  { %1936 = vmatpush3.bf16.msra.mxu1 %v2165_v31 }
 0x247   :  { %1937 = vmatprep.subr.bf16.mxu1 %v2166_v32 }
 0x24a   :  { %1938 = vmatpush3.bf16.msra.mxu1 %v2166_v32 }
 0x24b   :  { %1939 = vmatprep.subr.bf16.mxu1 %v2167_v33 }
 0x24e   :  { %1940 = vmatpush3.bf16.msra.mxu1 %v2167_v33  ;;  %v2192_v33 = vld [vmem:[#allocation2 + $0x100] sm:$0xff]  }
 0x24f   :  { %1953 = vmatprep.subr.bf16.mxu1 %v2168_v34 }
 0x304   :  { %v1923_v46 = vpop.f32.mrb[8].mxu1 }
 0x305   :  { %v568_v47 = vpop.f32.mrb[9].mxu1 }
 0x306   :  { %v1924_v48 = vpop.f32.mrb[10].mxu1 }
 0x307   :  { %v584_v49 = vpack.c.bf16 %v1924_v48, %v1923_v46  ;;  %v571_v50 = vpop.f32.mrb[11].mxu1 }
 0x308   :  { %v583_v51 = vpack.c.bf16 %v571_v50, %v568_v47 }
 0x30a   :  { %1941 = vmatprep.mubr.bf16.mxu1 %v583_v51 }
 0x30b   :  { %1942 = vmatmul.mubr.bf16.vlgmr.msra.gmra.mrb[0].mxu1 %v584_v49 }
 0x30c   :  { %1954 = vmatpush3.bf16.msra.mxu1 %v2168_v34  ;;  %1969 = vmatprep.mubr.bf16.mxu1 %v773_v40  ;;  %v2193_v34 = vld [vmem:[#allocation2 + $0x108] sm:$0xff]  }
 0x30d   :  { %1955 = vmatprep.subr.bf16.mxu1 %v2169_v52 }
 0x310   :  { %1956 = vmatpush3.bf16.msra.mxu1 %v2169_v52  ;;  %v2201_v52 = vld [vmem:[#allocation2 + $0x148] sm:$0xff]  }
 0x311   :  { %1957 = vmatprep.subr.bf16.mxu1 %v2170_v53 }
 0x314   :  { %1958 = vmatpush3.bf16.msra.mxu1 %v2170_v53  ;;  %v2202_v53 = vld [vmem:[#allocation2 + $0x150] sm:$0xff]  }
 0x315   :  { %1959 = vmatprep.subr.bf16.mxu1 %v2171_v54 }
 0x318   :  { %1960 = vmatpush3.bf16.msra.mxu1 %v2171_v54  ;;  %v2203_v54 = vld [vmem:[#allocation2 + $0x158] sm:$0xff]  }
 0x319   :  { %1961 = vmatprep.subr.bf16.mxu1 %v2172_v55 }
 0x31c   :  { %1962 = vmatpush3.bf16.msra.mxu1 %v2172_v55  ;;  %v2204_v55 = vld [vmem:[#allocation2 + $0x160] sm:$0xff]  }
 0x31d   :  { %1963 = vmatprep.subr.bf16.mxu1 %v2173_v56 }
 0x320   :  { %1964 = vmatpush3.bf16.msra.mxu1 %v2173_v56  ;;  %v2205_v56 = vld [vmem:[#allocation2 + $0x168] sm:$0xff]  }
 0x321   :  { %1965 = vmatprep.subr.bf16.mxu1 %v2174_v57 }
 0x324   :  { %1966 = vmatpush3.bf16.msra.mxu1 %v2174_v57  ;;  %v2206_v57 = vld [vmem:[#allocation2 + $0x170] sm:$0xff]  }
 0x325   :  { %1967 = vmatprep.subr.bf16.mxu1 %v2175_v58 }
 0x328   :  { %1968 = vmatpush3.bf16.msra.mxu1 %v2175_v58  ;;  %v2207_v58 = vld [vmem:[#allocation2 + $0x178] sm:$0xff]  }
 0x32b   :  { %1970 = vmatmul.mubr.bf16.vlgmr.msra.gmra.mrb[0].mxu1 %v774_v38  ;;  %v2198_v38 = vld [vmem:[#allocation2 + $0x130] sm:$0xff]  }
 0x32c   :  { %2053 = vmatprep.mubr.msk.bf16.mxu1 %vm338_vm1, %v2454_v16 }
 0x3fe   :  { %v1971_v63 = vpop.f32.mrb[0].mxu1 }
 0x3ff   :  { %v2094_v4 = vadd.f32 %v1971_v63, %v1657_v62  ;;  %v874_v5 = vpop.f32.mrb[1].mxu1 }
 0x400   :  { %v2095_v7 = vadd.f32 %v1657_v62, %v874_v5  ;;  %v1972_v9 = vpop.f32.mrb[2].mxu1 }
 0x401   :  { %v2096_v10 = vadd.f32 %v1972_v9, %v1657_v62  ;;  %v877_v11 = vpop.f32.mrb[3].mxu1  ;;  %v895_v14 = vmax.f32 %v2094_v4, 0.0 }
 0x402   :  { %v893_v12 = vmax.f32 %v2095_v7, 0.0  ;;  %v2097_v13 = vadd.f32 %v1657_v62, %v877_v11 }
 0x403   :  { %v896_v15 = vmax.f32 %v2096_v10, 0.0  ;;  %v2494_v21 = vadd.f32 %v895_v14, %v2429_v2  ;;  %v2186_v2 = vld [vmem:[#allocation2 + $0xd0] sm:$0xff]  }
 0x404   :  { %v894_v16 = vmax.f32 %v2097_v13, 0.0  ;;  %v2488_v19 = vadd.f32 %v893_v12, %v2425_v0  ;;  %v2184_v0 = vld [vmem:[#allocation2 + $0xc0] sm:$0xff]  }
 0x405   :  { %v2485_v18 = vadd.f32 %v896_v15, %v2431_v3  ;;  %v2187_v3 = vld [vmem:[#allocation2 + $0xd8] sm:$0xff]  }
 0x406   :  { %v2491_v20 = vadd.f32 %v894_v16, %v2427_v1  ;;  %v2185_v1 = vld [vmem:[#allocation2 + $0xc8] sm:$0xff]  }
 0x407   :  { %v902_v23 = vpack.c.bf16 %v2485_v18, %v2494_v21 }
 0x408   :  { %v901_v22 = vpack.c.bf16 %v2491_v20, %v2488_v19 }
 0x40a   :  { %1989 = vmatprep.mubr.bf16.mxu0 %v901_v22  ;;  %1993 = vmatprep.subr.bf16.mxu0 %v901_v22 }
 0x40b   :  { %2049 = vmatprep.subr.bf16.mxu1 %v901_v22  ;;  %1990 = vmatmul.mubr.bf16.vlgmr.msra.gmra.mrb[8].mxu0 %v902_v23 }
 0x40c   :  { %1994 = vmatpush3.bf16.msra.mxu0 %v901_v22  ;;  %2050 = vmatpush3.bf16.msra.mxu1 %v901_v22 }
 0x40d   :  { %1995 = vmatprep.subr.bf16.mxu0 %v902_v23  ;;  %2051 = vmatprep.subr.bf16.mxu1 %v902_v23 }
 0x40e   :  { %1997 = vmatprep.mubr.msk.bf16.mxu0 %vm338_vm1, %v2440_v6  ;;  %v2189_v6 = vld [vmem:[#allocation2 + $0xe8] sm:$0xff]  }
 0x410   :  { %1996 = vmatpush3.bf16.msra.mxu0 %v902_v23  ;;  %2052 = vmatpush3.bf16.msra.mxu1 %v902_v23 }
 0x411   :  { %2001 = vmatprep.subr.bf16.mxu0 %v2184_v0  ;;  %2088 = vmatprep.subr.bf16.mxu1 %v2310_v59 }
 0x413   :  { %1998 = vmatmul.mubr.msk.bf16.vlgmr.msra.gmra.mrb[12].mxu0 %vm338_vm1, %v2447_v8  ;;  %2054 = vmatmul.mubr.msk.bf16.vlgmr.msra.gmra.mrb[12].mxu1 %vm338_vm1, %v2459_v17  ;;  %v2191_v8 = vld [vmem:[#allocation2 + $0xf8] sm:$0xff]  }
 0x414   :  { %2002 = vmatpush3.bf16.msra.mxu0 %v2184_v0  ;;  %2085 = vmatprep.mubr.msk.f32.mxu1 %vm2311_vm2, %v2312_v60 }
 0x415   :  { %2003 = vmatprep.subr.bf16.mxu0 %v2185_v1 }
 0x418   :  { %2004 = vmatpush3.bf16.msra.mxu0 %v2185_v1 }
 0x419   :  { %2005 = vmatprep.subr.bf16.mxu0 %v2186_v2 }
 0x41c   :  { %2006 = vmatpush3.bf16.msra.mxu0 %v2186_v2 }
 0x41d   :  { %2007 = vmatprep.subr.bf16.mxu0 %v2187_v3 }
 0x420   :  { %2008 = vmatpush3.bf16.msra.mxu0 %v2187_v3 }
 0x421   :  { %2009 = vmatprep.subr.bf16.mxu0 %v2188_v25 }
 0x424   :  { %2010 = vmatpush3.bf16.msra.mxu0 %v2188_v25 }
 0x425   :  { %2011 = vmatprep.subr.bf16.mxu0 %v2189_v6 }
 0x428   :  { %2012 = vmatpush3.bf16.msra.mxu0 %v2189_v6 }
 0x429   :  { %2013 = vmatprep.subr.bf16.mxu0 %v2190_v27 }
 0x42c   :  { %2014 = vmatpush3.bf16.msra.mxu0 %v2190_v27 }
 0x42d   :  { %2015 = vmatprep.subr.bf16.mxu0 %v2191_v8 }
 0x430   :  { %2016 = vmatpush3.bf16.msra.mxu0 %v2191_v8 }
 0x431   :  { %2021 = vmatprep.subr.bf16.mxu0 %v901_v22 }
 0x4e6   :  { %v1999_v17 = vpop.f32.mrb[12].mxu0  ;;  %v2055_v40 = vpop.f32.mrb[12].mxu1 }
 0x4e7   :  { %v1059_v28 = vpop.f32.mrb[13].mxu0  ;;  %v1397_v41 = vpop.f32.mrb[13].mxu1 }
 0x4e8   :  { %v2000_v29 = vpop.f32.mrb[14].mxu0  ;;  %v2056_v42 = vpop.f32.mrb[14].mxu1 }
 0x4e9   :  { %v1075_v30 = vpack.c.bf16 %v2000_v29, %v1999_v17  ;;  %v1062_v31 = vpop.f32.mrb[15].mxu0  ;;  %v1413_v43 = vpack.c.bf16 %v2056_v42, %v2055_v40  ;;  %v1400_v44 = vpop.f32.mrb[15].mxu1 }
 0x4ea   :  { %v1074_v32 = vpack.c.bf16 %v1062_v31, %v1059_v28  ;;  %v1412_v45 = vpack.c.bf16 %v1400_v44, %v1397_v41 }
 0x4ec   :  { %2017 = vmatprep.mubr.bf16.mxu0 %v1074_v32 }
 0x4ed   :  { %2018 = vmatmul.mubr.bf16.vlgmr.msra.gmra.mrb[8].mxu0 %v1075_v30 }
 0x4ee   :  { %2022 = vmatpush3.bf16.msra.mxu0 %v901_v22  ;;  %2025 = vmatprep.mubr.msk.bf16.mxu0 %vm338_vm1, %v2468_v24  ;;  %v2197_v24 = vld [vmem:[#allocation2 + $0x128] sm:$0xff]  }
 0x4ef   :  { %2023 = vmatprep.subr.bf16.mxu0 %v902_v23 }
 0x4f2   :  { %2024 = vmatpush3.bf16.msra.mxu0 %v902_v23 }
 0x4f3   :  { %2029 = vmatprep.subr.bf16.mxu0 %v2192_v33 }
 0x4f5   :  { %2026 = vmatmul.mubr.msk.bf16.vlgmr.msra.gmra.mrb[16].mxu0 %vm338_vm1, %v2475_v26  ;;  %v2200_v26 = vld [vmem:[#allocation2 + $0x140] sm:$0xff]  }
 0x4f6   :  { %2030 = vmatpush3.bf16.msra.mxu0 %v2192_v33 }
 0x4f7   :  { %2031 = vmatprep.subr.bf16.mxu0 %v2193_v34 }
 0x4fa   :  { %2032 = vmatpush3.bf16.msra.mxu0 %v2193_v34 }
 0x4fb   :  { %2033 = vmatprep.subr.bf16.mxu0 %v2194_v35 }
 0x4fe   :  { %2034 = vmatpush3.bf16.msra.mxu0 %v2194_v35 }
 0x4ff   :  { %2035 = vmatprep.subr.bf16.mxu0 %v2195_v36 }
 0x502   :  { %2036 = vmatpush3.bf16.msra.mxu0 %v2195_v36 }
 0x503   :  { %2037 = vmatprep.subr.bf16.mxu0 %v2196_v37 }
 0x506   :  { %2038 = vmatpush3.bf16.msra.mxu0 %v2196_v37 }
 0x507   :  { %2039 = vmatprep.subr.bf16.mxu0 %v2197_v24 }
 0x50a   :  { %2040 = vmatpush3.bf16.msra.mxu0 %v2197_v24 }
 0x50b   :  { %2041 = vmatprep.subr.bf16.mxu0 %v2198_v38 }
 0x50e   :  { %2042 = vmatpush3.bf16.msra.mxu0 %v2198_v38 }
 0x50f   :  { %2043 = vmatprep.subr.bf16.mxu0 %v2199_v39 }
 0x512   :  { %2044 = vmatpush3.bf16.msra.mxu0 %v2199_v39 }
 0x513   :  { %2057 = vmatprep.subr.bf16.mxu0 %v2200_v26 }
 0x5c8   :  { %v2027_v46 = vpop.f32.mrb[16].mxu0 }
 0x5c9   :  { %v1228_v47 = vpop.f32.mrb[17].mxu0 }
 0x5ca   :  { %v2028_v48 = vpop.f32.mrb[18].mxu0 }
 0x5cb   :  { %v1244_v49 = vpack.c.bf16 %v2028_v48, %v2027_v46  ;;  %v1231_v50 = vpop.f32.mrb[19].mxu0 }
 0x5cc   :  { %v1243_v51 = vpack.c.bf16 %v1231_v50, %v1228_v47 }
 0x5ce   :  { %2045 = vmatprep.mubr.bf16.mxu0 %v1243_v51 }
 0x5cf   :  { %2046 = vmatmul.mubr.bf16.vlgmr.msra.gmra.mrb[8].mxu0 %v1244_v49 }
 0x5d0   :  { %2058 = vmatpush3.bf16.msra.mxu0 %v2200_v26  ;;  %2073 = vmatprep.mubr.bf16.mxu0 %v1412_v45 }
 0x5d1   :  { %2059 = vmatprep.subr.bf16.mxu0 %v2201_v52 }
 0x5d4   :  { %2060 = vmatpush3.bf16.msra.mxu0 %v2201_v52 }
 0x5d5   :  { %2061 = vmatprep.subr.bf16.mxu0 %v2202_v53 }
 0x5d8   :  { %2062 = vmatpush3.bf16.msra.mxu0 %v2202_v53 }
 0x5d9   :  { %2063 = vmatprep.subr.bf16.mxu0 %v2203_v54 }
 0x5dc   :  { %2064 = vmatpush3.bf16.msra.mxu0 %v2203_v54 }
 0x5dd   :  { %2065 = vmatprep.subr.bf16.mxu0 %v2204_v55 }
 0x5e0   :  { %2066 = vmatpush3.bf16.msra.mxu0 %v2204_v55 }
 0x5e1   :  { %2067 = vmatprep.subr.bf16.mxu0 %v2205_v56 }
 0x5e4   :  { %2068 = vmatpush3.bf16.msra.mxu0 %v2205_v56 }
 0x5e5   :  { %2069 = vmatprep.subr.bf16.mxu0 %v2206_v57 }
 0x5e8   :  { %2070 = vmatpush3.bf16.msra.mxu0 %v2206_v57 }
 0x5e9   :  { %2071 = vmatprep.subr.bf16.mxu0 %v2207_v58 }
 0x5ec   :  { %2072 = vmatpush3.bf16.msra.mxu0 %v2207_v58 }
 0x5ef   :  { %2074 = vmatmul.mubr.bf16.vlgmr.msra.gmra.mrb[8].mxu0 %v1413_v43 }
 0x6c2   :  { %v2075_v62 = vpop.f32.mrb[8].mxu0 }
 0x6c3   :  { %v2098_v63 = vadd.f32 %v2075_v62, %v1711_v61  ;;  %v1513_v4 = vpop.f32.mrb[9].mxu0 }
 0x6c4   :  { %v2099_v5 = vadd.f32 %v1711_v61, %v1513_v4  ;;  %v2076_v7 = vpop.f32.mrb[10].mxu0 }
 0x6c5   :  { %v1534_v9 = vmax.f32 %v2098_v63, 0.0  ;;  %v2100_v10 = vadd.f32 %v2076_v7, %v1711_v61  ;;  %v1516_v11 = vpop.f32.mrb[11].mxu0 }
 0x6c6   :  { %v1532_v12 = vmax.f32 %v2099_v5, 0.0  ;;  %v2101_v13 = vadd.f32 %v1711_v61, %v1516_v11 }
 0x6c7   :  { %v1538_v14 = vadd.f32 %v1534_v9, %v2494_v21  ;;  %v1535_v15 = vmax.f32 %v2100_v10, 0.0  ;;  %v1544_v21 = vld [vmem:[%s2554_s9] sm:$0x3] }
 0x6c8   :  { %v1536_v16 = vadd.f32 %v1532_v12, %v2488_v19  ;;  %v1533_v22 = vmax.f32 %v2101_v13, 0.0 }
 0x6c9   :  { %1542 = vst [vmem:[#allocation7 + $0x10] sm:$0xff] %v1538_v14  ;;  %v1539_v23 = vadd.f32 %v1535_v15, %v2485_v18 }
 0x6ca   :  { %1540 = vst [vmem:[#allocation7] sm:$0xff] %v1536_v16  ;;  %v1537_v0 = vadd.f32 %v1533_v22, %v2491_v20 }
 0x6cb   :  { %1543 = vst [vmem:[#allocation7 + $0x18] sm:$0xff] %v1539_v23  ;;  %v2092_v1 = vpack.c.bf16 %v1539_v23, %v1538_v14 }
 0x6cc   :  { %1541 = vst [vmem:[#allocation7 + $0x8] sm:$0xff] %v1537_v0  ;;  %v2089_v2 = vpack.c.bf16 %v1537_v0, %v1536_v16 }
 0x6ce   :  { %2090 = vmatpush3.bf16.msra.mxu1 %v2089_v2 }
 0x6cf   :  { %2091 = vmatprep.subr.bf16.mxu1 %v2310_v59 }
 0x6d2   :  { %2093 = vmatpush3.bf16.msra.mxu1 %v2092_v1 }
 0x6d5   :  { %2086 = vmatmul.mubr.msk.f32.vlgmr.msra.gmra.mrb[16].mxu1 %vm338_vm1, %v1544_v21 }
 0x6d6   :  { %2265 = shalt.err (!%p2262_p6)
}
 0x6d7   :  { %s2266_s1 = scalar_lea.hbm %s2555_s10, 512 }
 0x6d8   :  { %p2267_p7 = scmp.ne.s32.totalorder %s2555_s10, %s2266_s1  ;;  %p2270_p8 = scmp.lt.u32.totalorder %s2266_s1, %s2555_s10 }
 0x6da   :  { %p2272_p9 = pnand %p2270_p8, %p2267_p7 }
 0x6dc   :  { %2275 = shalt.err (!%p2272_p9)
}
 0x6dd   :  { %s2314_s15 = smov 128   ;;  %s2315_s3 = smov 8  }
 0x6de   :  { %1630 = dma.vmem_to_hbm [thread:$0]  %s1625_s14, 512, %s2555_s10, [#allocation4], %s2314_s15, %s2314_s15, %s2315_s3  }
 0x6df   :  { %s2316_s17 = smov [#allocation8]  }
 0x6e0   :  { %s1637_s19 = sshll.u32 %s2316_s17, 4  ;;  %s1638_s19 = int_to_ptr.vmem [resolvable:$true] %s1637_s19 }
 0x6e1   :  { %s2276_s20 = scalar_lea.vmem %s1638_s19, 32  ;;  %p2281_p11 = scmp.lt.s32.totalorder %s1638_s19, %s1638_s19 }
 0x6e2   :  { %p2277_p10 = scmp.ne.s32.totalorder %s1638_s19, %s2276_s20  ;;  %p2282_p12 = scmp.lt.s32.totalorder %s2276_s20, %s2276_s20 }
 0x6e4   :  { %p2283_p13 = por %p2282_p12, %p2281_p11 }
 0x6e6   :  { %p2284_p0 = pnand %p2283_p13, %p2277_p10 }
 0x7a8   :  { %v1614_v18 = vpop.f32.mrb[16].mxu1 }
 0x7a9   :  { %1618 = vst [vmem:[#allocation8] sm:$0x3] %v1614_v18  ;;  %v2087_v19 = vpop.f32.mrb[17].mxu1 }
 0x7aa   :  { %2287 = shalt.err (!%p2284_p0)
}
 0x7ab   :  { %s2288_s6 = scalar_lea.hbm %s2556_s11, 32 }
 0x7ac   :  { %p2289_p1 = scmp.ne.s32.totalorder %s2556_s11, %s2288_s6  ;;  %p2292_p2 = scmp.lt.u32.totalorder %s2288_s6, %s2556_s11 }
 0x7ae   :  { %p2294_p3 = pnand %p2292_p2, %p2289_p1 }
 0x7b0   :  { %2297 = shalt.err (!%p2294_p3)
}
 0x7b1   :  { %1640 = dma.vmem_to_hbm [thread:$0]  %s1638_s19, 32, %s2556_s11, [#allocation9]  }
 0x7b2   :  { %2302 = dma.done.wait [#allocation4], 512  }
 0x7b3   :  { %2303 = vsyncadd [#allocation4], 4294966784 }
 0x7b4   :  { %2304 = dma.done.wait [#allocation9], 32  }
 0x7b5   :  { %2305 = vsyncadd [#allocation9], 4294967264 }
 0x7b6   :  { %1647 = vsyncpa [#allocation3], 1 }
 0x7b7   :  { %1648 = vsyncpa [#allocation6], 1 }
 0x7b8   :  { %1649 = vsyncpa [#allocation4], 1 }
 0x7b9   :  { %1650 = vsyncpa [#allocation9], 1 }

</bundles_post_ra>
